<compile_context>
chip_gen: v6e
topology: v6e:2x2x1
jax: 0.10.0
libtpu: 0.0.40
codegen_flags: <defaults>
</compile_context>

<pallas_src>
import jax
import jax.numpy as jnp
from jax.experimental import pallas as pl
from jax.experimental.pallas import tpu as pltpu


def _round_up(n, m):
    return (n + m - 1) // m * m


def _cdiv(a, b):
    return -(-a // b)


# ~8 MiB of lane-padded x per tile -> ~16 MiB double-buffered.
_TARGET_TILE_BYTES = 8 * 1024 * 1024
# Safe explicit scoped-VMEM limit on every generation (v5e/v6e 128 MiB,
# v7x 64 MiB physical); our budgeted footprint is well under it.
_VMEM_LIMIT_BYTES = 48 * 1024 * 1024


def _choose_block_b(B, D):
    """Rows per batch tile, sized by *padded* bytes (lanes pad to 128)."""
    lane_d = _round_up(D, 128)
    tb = _TARGET_TILE_BYTES // (lane_d * 4)
    tb = max(8, (tb // 8) * 8)
    tb = min(tb, _round_up(B, 8))
    # Give megacore (v7x) at least two tiles to shard when the batch allows it.
    if B > 8 and _cdiv(B, tb) < 2:
        tb = _round_up(_cdiv(B, 2), 8)
    return int(tb)


def dense2_fused_kernel(x_ref, w_ref, o_ref):
    # x: [TB, D], w: [1, D] holding (w1 @ w2)^T, o: [1, 8, TB//8] (lane-dense).
    # fc2(fc1(x)) == x @ (w1 @ w2): broadcast multiply on the VPU, lane
    # reduction on the XLU; no MXU op needed for an N=1 projection.
    prod = x_ref[...] * w_ref[...]
    s = jnp.sum(prod, axis=-1, keepdims=True)          # [TB, 1], f32
    # Sublane->lane transpose of the per-tile reduction so the writeback is an
    # unmasked, lane-dense store instead of masked (TB, 1) column stores.
    o_ref[...] = s.reshape(o_ref.shape).astype(o_ref.dtype)


@jax.jit
def dense2_forward(x, w1, w2):
    B, D = x.shape
    assert w1.shape[0] == D and w1.shape[1] == w2.shape[0] and w2.shape[1] == 1

    # Fold the two bias-free linear layers once in the wrapper:
    #   (x @ w1) @ w2 == x @ (w1 @ w2); present as a lane-dense [1, D] row.
    w_row = (w1 @ w2).reshape(1, D).astype(jnp.float32)

    TB = _choose_block_b(B, D)
    num_tiles = _cdiv(B, TB)        # ragged last tile; no full-array jnp.pad copy
    tb_lane = TB // 8

    out = pl.pallas_call(
        dense2_fused_kernel,
        out_shape=jax.ShapeDtypeStruct((num_tiles, 8, tb_lane), jnp.float32),
        grid_spec=pl.GridSpec(
            grid=(num_tiles,),
            in_specs=[
                # x: tiled over the batch axis, pipelined through VMEM.
                pl.BlockSpec((TB, D), lambda i: (i, 0)),
                # fused weight row: constant index -> stays VMEM-resident.
                pl.BlockSpec((1, D), lambda i: (0, 0)),
            ],
            # Lane-dense output block; last two dims equal the array's, so the
            # (8, 128) divisibility rule is always satisfied.
            out_specs=pl.BlockSpec((1, 8, tb_lane), lambda i: (i, 0, 0)),
        ),
        compiler_params=pltpu.CompilerParams(
            # Batch tiles are independent -> megacore can shard them on v7x.
            dimension_semantics=("parallel",),
            vmem_limit_bytes=_VMEM_LIMIT_BYTES,
        ),
        cost_estimate=pl.CostEstimate(
            flops=2 * B * D,
            transcendentals=0,
            bytes_accessed=B * D * 4 + D * 4 + num_tiles * TB * 4,
        ),
    )(x.astype(jnp.float32), w_row)

    # Rows >= B (junk from the partial last x block) are discarded here.
    return out.reshape(-1)[:B].reshape(B, 1)


def init_params(key, input_dim):
    # Deterministic init mimicking torch.nn.Linear's uniform(-1/sqrt(fan_in), +).
    k1, k2 = jax.random.split(key)
    bound1 = 1.0 / jnp.sqrt(jnp.float32(input_dim))
    bound2 = 1.0 / jnp.sqrt(jnp.float32(10))
    # Stored already transposed relative to torch (torch weight is [out, in]).
    w1 = jax.random.uniform(k1, (input_dim, 10), jnp.float32, -bound1, bound1)
    w2 = jax.random.uniform(k2, (10, 1), jnp.float32, -bound2, bound2)
    return w1, w2


@jax.jit
def dense2_predict(x, w1, w2):
    # Mirrors Dense2.predict: round(sigmoid(forward(x))). Elementwise glue in JAX.
    return jnp.round(jax.nn.sigmoid(dense2_forward(x, w1, w2)))


if __name__ == "__main__":
    key = jax.random.PRNGKey(0)
    kx, kp, kx2 = jax.random.split(key, 3)

    B, input_dim = 8, 32
    x = jax.random.normal(kx, (B, input_dim), dtype=jnp.float32)
    w1, w2 = init_params(kp, input_dim)

    out = jax.block_until_ready(dense2_forward(x, w1, w2))

    # Reference in plain JAX, same math as torch: (x @ W1.T) @ W2.T.
    ref = (x @ w1) @ w2
    assert out.shape == (B, 1)
    assert jnp.allclose(out, ref, atol=1e-4, rtol=1e-4)

    # Exercise the ragged-batch path (B not a multiple of the tile).
    B2 = 20
    x2 = jax.random.normal(kx2, (B2, input_dim), dtype=jnp.float32)
    out2 = jax.block_until_ready(dense2_forward(x2, w1, w2))
    ref2 = (x2 @ w1) @ w2
    assert out2.shape == (B2, 1)
    assert jnp.allclose(out2, ref2, atol=1e-4, rtol=1e-4)

    preds = jax.block_until_ready(dense2_predict(x, w1, w2))
    assert preds.shape == (B, 1)

    print("KERNEL_OK")
</pallas_src>

<mosaic_0001>
module attributes {stable_mosaic.version = 11 : i64} {
  func.func @dense2_fused_kernel(%arg0: i32, %arg1: memref<8x32xf32, #tpu.memory_space<vmem>>, %arg2: memref<1x32xf32, #tpu.memory_space<vmem>>, %arg3: memref<1x8x1xf32, #tpu.memory_space<vmem>>) attributes {dimension_semantics = [#tpu.dimension_semantics<parallel>], iteration_bounds = array<i64: 1>, scalar_prefetch = 0 : i64, scratch_operands = 0 : i64, tpu.core_type = #tpu.core_type<tc>, window_params = [{transform_indices = @transform_0, window_bounds = array<i64: 8, 32>}, {pipeline_mode = #tpu.pipeline_mode<synchronous>, transform_indices = @transform_1, window_bounds = array<i64: 1, 32>}, {transform_indices = @transform_2, window_bounds = array<i64: 1, 8, 1>}]} {
    %c0 = arith.constant 0 : index
    %c0_0 = arith.constant 0 : index
    %0 = vector.load %arg1[%c0, %c0_0] : memref<8x32xf32, #tpu.memory_space<vmem>>, vector<8x32xf32>
    %c0_1 = arith.constant 0 : index
    %c0_2 = arith.constant 0 : index
    %1 = vector.load %arg2[%c0_1, %c0_2] : memref<1x32xf32, #tpu.memory_space<vmem>>, vector<1x32xf32>
    %2 = vector.broadcast %1 : vector<1x32xf32> to vector<8x32xf32>
    %3 = arith.mulf %0, %2 : vector<8x32xf32>
    %cst = arith.constant dense<0.000000e+00> : vector<8xf32>
    %4 = vector.multi_reduction <add>, %3, %cst [1] : vector<8x32xf32> to vector<8xf32>
    %5 = vector.shape_cast %4 : vector<8xf32> to vector<8x1xf32>
    %6 = vector.shape_cast %5 : vector<8x1xf32> to vector<1x8x1xf32>
    %c0_3 = arith.constant 0 : index
    %c0_4 = arith.constant 0 : index
    %c0_5 = arith.constant 0 : index
    %7 = vector.load %arg3[%c0_3, %c0_4, %c0_5] : memref<1x8x1xf32, #tpu.memory_space<vmem>>, vector<1x8x1xf32>
    tpu.vector_store %arg3[%c0_3, %c0_4, %c0_5], %6 {strides = array<i32>} : memref<1x8x1xf32, #tpu.memory_space<vmem>>, vector<1x8x1xf32>,
    return
  }
  func.func @transform_0(%arg0: i32) -> (i32, i32) {
    %c0_i32 = arith.constant 0 : i32
    %c0_i32_0 = arith.constant 0 : i32
    return %arg0, %c0_i32 : i32, i32
  }
  func.func @transform_1(%arg0: i32) -> (i32, i32) {
    %c0_i32 = arith.constant 0 : i32
    %c0_i32_0 = arith.constant 0 : i32
    %c0_i32_1 = arith.constant 0 : i32
    return %c0_i32, %c0_i32_0 : i32, i32
  }
  func.func @transform_2(%arg0: i32) -> (i32, i32, i32) {
    %c0_i32 = arith.constant 0 : i32
    %c0_i32_0 = arith.constant 0 : i32
    %c0_i32_1 = arith.constant 0 : i32
    return %arg0, %c0_i32, %c0_i32_0 : i32, i32, i32
  }
}

</mosaic_0001>

<bundles_post_ra>
// kernel: dense2_forward.1
= control target key start
LH: loop header
LB: loop body
LE: loop exit
PB: predicated region body
PF: predicated region fallthrough
CT: control target
= control target key end

     0   :  { %vm20_vm0 = vcmask 261120   ;;  %vm24_vm1 = vcmask 7168   ;;  %s55_s0 = inlined_call_operand.vmem [shape: f32[8,32], index: 0, kind: input, shape index: {}]   ;;  %s56_s1 = inlined_call_operand.vmem [shape: f32[1,32], index: 1, kind: input, shape index: {}]   ;;  %s57_s2 = inlined_call_operand.vmem [shape: f32[1,8,1], index: 2, kind: output, shape index: {}]  }
   0x1   :  { %v11_v0 = vld [vmem:[%s55_s0] sm:$0xff] }
   0x2   :  { %v30_v1 = vld [vmem:[%s56_s1] ss:$0 sm:$0xff] }
   0x3   :  { %v19_v2 = vmul.f32 %v30_v1, %v11_v0 }
   0x5   :  { %v21_v3 = vsel %vm20_vm0, %v19_v2, 0.0 }
   0x6   :  { %22 = vadd.xlane.f32.xlu0 %v21_v3 }
  0x8f   :  { %v23_v4 = vpop.xlane.xlu0 %22 }
  0x90   :  { %25 = vst.msk [vmem:[%s57_s2] sm:$0xff] %vm24_vm1, %v23_v4 }

</bundles_post_ra>
